<compile_context>
chip_gen: v6e
topology: v6e:2x2x1
jax: 0.10.0
libtpu: 0.0.40
codegen_flags: <defaults>
</compile_context>

<pallas_src>
import functools

import numpy as np
import jax
import jax.numpy as jnp
from jax import lax
from jax.experimental import pallas as pl
from jax.experimental.pallas import tpu as pltpu


def _round_up(x, m):
    return ((x + m - 1) // m) * m


def _device_tuning():
    """Per-generation batch-tile cap and scoped-VMEM limit (best effort)."""
    try:
        kind = jax.devices()[0].device_kind.lower()
    except Exception:
        kind = ""
    is_v5e = ("v5 lite" in kind) or ("v5e" in kind) or ("v5litepod" in kind)
    is_v7 = "v7" in kind
    tb_cap = 128 if is_v5e else 256        # v5e: single vst slot -> smaller tile
    vmem_limit = (48 << 20) if is_v7 else (64 << 20)
    return tb_cap, vmem_limit


# ---------------------------------------------------------------------------
# Kernel
# ---------------------------------------------------------------------------
def iaf_kernel(x_ref, w1_ref, b1_ref, wms_ref, bms_ref, xout_ref, ld_ref,
               *, depth, d_pad):
    """All `depth` IAF layers fused into a single grid step per batch tile.

    Shapes (Dp/Hp lane-padded, TB batch tile):
      x_ref    : (TB, Dp)          f32
      w1_ref   : (L, Dp, Hp)       masked hidden weights (f32 or bf16)
      b1_ref   : (L, 1, Hp)        f32
      wms_ref  : (L, Hp, 2*Dp)     fused [m | log_s] head weights
      bms_ref  : (L, 1, 2*Dp)      f32
      xout_ref : (TB, Dp)          f32
      ld_ref   : (TB, 1)           f32
    """
    x0 = x_ref[...].astype(jnp.float32)
    wdt = w1_ref.dtype  # matmul-input dtype (f32 default, bf16 fast path)

    def layer(l, carry):
        x, ld = carry
        # Masked hidden layer + ReLU (accumulate in f32 on the MXU).
        h = jnp.dot(x.astype(wdt), w1_ref[l],
                    preferred_element_type=jnp.float32) + b1_ref[l]
        h = jnp.maximum(h, 0.0)
        # Fused output heads: one matmul produces [m | log_s].
        ms = jnp.dot(h.astype(wdt), wms_ref[l],
                     preferred_element_type=jnp.float32) + bms_ref[l]
        m = ms[:, :d_pad]
        log_s = ms[:, d_pad:]
        # IAF affine update (f32).
        x = jnp.exp(log_s) * x + m
        # Per-layer cross-lane reduce (XLU slot, otherwise idle) into a
        # (TB, 1) accumulator; avoids a lane-dense (TB, Dp) carry that spills
        # around every matmul.  Padded log_s lanes are exactly 0.
        ld = ld + jnp.sum(log_s, axis=1, keepdims=True)
        return x, ld

    x, ld = lax.fori_loop(
        0, depth, layer,
        (x0, jnp.zeros((x0.shape[0], 1), jnp.float32)),
        unroll=min(depth, 4))

    xout_ref[...] = x
    ld_ref[...] = -ld


# ---------------------------------------------------------------------------
# One-time parameter preparation (hoisted out of the per-call path)
# ---------------------------------------------------------------------------
class IAFParams:
    """Padded + head-fused parameters, built once at setup time."""

    def __init__(self, D, Dp, Hp, depth, w1, b1, wms, bms):
        self.D, self.Dp, self.Hp, self.depth = D, Dp, Hp, depth
        self.w1, self.b1, self.wms, self.bms = w1, b1, wms, bms


def prepare_iaf_params(w1, b1, wm, bm, ws, bs, weight_dtype=jnp.float32):
    """Pad D/H to lane multiples of 128 and fuse the m / log_s heads.

    w1: (L, D, H)  b1: (L, H)   (pre-transposed for row-major x @ W)
    wm: (L, H, D)  bm: (L, D)
    ws: (L, H, D)  bs: (L, D)

    Zero padding keeps semantics exact: padded x columns stay 0 through
    exp(0)*0 + 0, and padded log_s columns are 0 so the log-det sum is exact.
    `weight_dtype=jnp.bfloat16` enables the bf16 MXU fast path (biases and
    accumulation stay f32).
    """
    L, D, H = w1.shape
    Dp = _round_up(D, 128)
    Hp = _round_up(H, 128)
    f32 = jnp.float32

    w1_p = (jnp.zeros((L, Dp, Hp), weight_dtype)
            .at[:, :D, :H].set(w1.astype(weight_dtype)))
    b1_p = jnp.zeros((L, 1, Hp), f32).at[:, 0, :H].set(b1.astype(f32))
    wms_p = (jnp.zeros((L, Hp, 2 * Dp), weight_dtype)
             .at[:, :H, :D].set(wm.astype(weight_dtype))
             .at[:, :H, Dp:Dp + D].set(ws.astype(weight_dtype)))
    bms_p = (jnp.zeros((L, 1, 2 * Dp), f32)
             .at[:, 0, :D].set(bm.astype(f32))
             .at[:, 0, Dp:Dp + D].set(bs.astype(f32)))

    return IAFParams(D, Dp, Hp, L, w1_p, b1_p, wms_p, bms_p)


# ---------------------------------------------------------------------------
# Forward wrapper
# ---------------------------------------------------------------------------
def iaf_forward(x, params):
    """x: (B, D) f32; params: IAFParams.  Returns (x_out (B, D), log_det (B,))."""
    B, D = x.shape
    assert D == params.D
    Dp, Hp, L = params.Dp, params.Hp, params.depth
    f32 = jnp.float32

    tb_cap, vmem_limit = _device_tuning()
    # Aim for >=2 batch tiles so the "parallel" batch axis can shard across
    # the two v7x TensorCores; always a multiple of 8 sublanes.
    TB = min(tb_cap, _round_up(max(8, -(-B // 2)), 8))
    Bp = _round_up(B, TB)

    needs_pad = (Bp != B) or (Dp != D)
    if needs_pad:
        x_in = jnp.zeros((Bp, Dp), f32).at[:B, :D].set(x.astype(f32))
    else:
        x_in = x.astype(f32)   # common aligned case: no extra HBM copy

    kernel = functools.partial(iaf_kernel, depth=L, d_pad=Dp)

    x_out, log_det = pl.pallas_call(
        kernel,
        out_shape=(
            jax.ShapeDtypeStruct((Bp, Dp), f32),
            jax.ShapeDtypeStruct((Bp, 1), f32),
        ),
        grid_spec=pltpu.PrefetchScalarGridSpec(
            num_scalar_prefetch=0,
            grid=(Bp // TB,),
            in_specs=[
                pl.BlockSpec((TB, Dp), lambda b: (b, 0)),
                # Full-extent weight blocks: resident across all batch tiles.
                pl.BlockSpec((L, Dp, Hp), lambda b: (0, 0, 0)),
                pl.BlockSpec((L, 1, Hp), lambda b: (0, 0, 0)),
                pl.BlockSpec((L, Hp, 2 * Dp), lambda b: (0, 0, 0)),
                pl.BlockSpec((L, 1, 2 * Dp), lambda b: (0, 0, 0)),
            ],
            out_specs=[
                pl.BlockSpec((TB, Dp), lambda b: (b, 0)),
                pl.BlockSpec((TB, 1), lambda b: (b, 0)),
            ],
        ),
        compiler_params=pltpu.CompilerParams(
            dimension_semantics=("parallel",),
            vmem_limit_bytes=vmem_limit),
        # Alias x buffer to x_out only when x_in is a fresh padded copy
        # (donation is then free); otherwise XLA would defensively copy the
        # caller's buffer anyway.
        input_output_aliases=({0: 0} if needs_pad else {}),
    )(x_in, params.w1, params.b1, params.wms, params.bms)

    return x_out[:B, :D], log_det[:B, 0]


# ---------------------------------------------------------------------------
# Deterministic MADE-masked parameters + pure-JAX reference
# ---------------------------------------------------------------------------
def make_params(key, in_dim, h_dim, depth):
    """Deterministic MADE-masked parameters, stacked across depth.
    Weights are stored pre-transposed for row-major x @ W in the kernel."""
    D, H = in_dim, h_dim

    deg_in = np.arange(1, D + 1)                               # 1..D
    deg_hid = (np.arange(H) % max(1, D - 1)) + 1               # 1..D-1
    mask_h = (deg_hid[:, None] >= deg_in[None, :])             # (H, D)
    mask_o = (deg_in[:, None] > deg_hid[None, :])              # (D, H)
    mask_h = jnp.asarray(mask_h, jnp.float32)
    mask_o = jnp.asarray(mask_o, jnp.float32)

    def uniform(k, shape, fan_in):
        bound = 1.0 / np.sqrt(fan_in)
        return jax.random.uniform(k, shape, jnp.float32, -bound, bound)

    w1s, b1s, wms, bms, wss, bss = [], [], [], [], [], []
    for l in range(depth):
        k = jax.random.fold_in(key, l)
        k1, k2, k3, k4, k5, k6 = jax.random.split(k, 6)
        W1 = uniform(k1, (H, D), D) * mask_h                   # torch (out,in)
        Wm = uniform(k2, (D, H), H) * mask_o
        Ws = uniform(k3, (D, H), H) * mask_o
        b1 = uniform(k4, (H,), D)
        bm = uniform(k5, (D,), H)
        bs = uniform(k6, (D,), H)
        w1s.append(W1.T)          # (D, H)
        wms.append(Wm.T)          # (H, D)
        wss.append(Ws.T)          # (H, D)
        b1s.append(b1)
        bms.append(bm)
        bss.append(bs)

    return (jnp.stack(w1s), jnp.stack(b1s), jnp.stack(wms),
            jnp.stack(bms), jnp.stack(wss), jnp.stack(bss))


def iaf_reference(x, w1, b1, wm, bm, ws, bs):
    """Pure-JAX reference matching the PyTorch forward (num_stable=False)."""
    L = w1.shape[0]
    log_det = jnp.zeros((x.shape[0],), jnp.float32)
    for l in range(L):
        h = jnp.maximum(x @ w1[l] + b1[l][None, :], 0.0)
        m = h @ wm[l] + bm[l][None, :]
        log_s = h @ ws[l] + bs[l][None, :]
        x = jnp.exp(log_s) * x + m
        log_det = log_det - jnp.sum(log_s, axis=1)
    return x, log_det


if __name__ == "__main__":
    B, D, H, depth = 2, 16, 32, 3

    key = jax.random.PRNGKey(0)
    kx, kp = jax.random.split(key)
    x = jax.random.normal(kx, (B, D), jnp.float32)
    raw = make_params(kp, D, H, depth)

    # One-time parameter prep (padding + head fusion hoisted out of forward).
    prep_f32 = prepare_iaf_params(*raw)

    x_out, log_det = iaf_forward(x, prep_f32)
    jax.block_until_ready((x_out, log_det))

    x_ref, ld_ref = iaf_reference(x, *raw)
    np.testing.assert_allclose(np.asarray(x_out), np.asarray(x_ref),
                               rtol=1e-5, atol=1e-5)
    np.testing.assert_allclose(np.asarray(log_det), np.asarray(ld_ref),
                               rtol=1e-5, atol=1e-5)

    # bf16-weight fast path (~3x MXU throughput, half the weight HBM/VMEM),
    # gated behind a looser tolerance check as recommended; exp / affine
    # update / accumulation stay in f32 inside the kernel.
    prep_bf16 = prepare_iaf_params(*raw, weight_dtype=jnp.bfloat16)
    x_bf, ld_bf = iaf_forward(x, prep_bf16)
    jax.block_until_ready((x_bf, ld_bf))
    np.testing.assert_allclose(np.asarray(x_bf), np.asarray(x_ref),
                               rtol=1e-1, atol=1e-1)
    np.testing.assert_allclose(np.asarray(ld_bf), np.asarray(ld_ref),
                               rtol=1e-1, atol=1e-1)

    print("KERNEL_OK")
</pallas_src>

<mosaic_0001>
module attributes {stable_mosaic.version = 11 : i64} {
  func.func @iaf_kernel(%arg0: i32, %arg1: memref<8x128xf32, #tpu.memory_space<vmem>>, %arg2: memref<3x128x128xf32, #tpu.memory_space<vmem>>, %arg3: memref<3x1x128xf32, #tpu.memory_space<vmem>>, %arg4: memref<3x128x256xf32, #tpu.memory_space<vmem>>, %arg5: memref<3x1x256xf32, #tpu.memory_space<vmem>>, %arg6: memref<8x128xf32, #tpu.memory_space<vmem>>, %arg7: memref<8x1xf32, #tpu.memory_space<vmem>>) attributes {dimension_semantics = [#tpu.dimension_semantics<parallel>], iteration_bounds = array<i64: 1>, scalar_prefetch = 0 : i64, scratch_operands = 0 : i64, tpu.core_type = #tpu.core_type<tc>, window_params = [{transform_indices = @transform_0, window_bounds = array<i64: 8, 128>}, {pipeline_mode = #tpu.pipeline_mode<synchronous>, transform_indices = @transform_1, window_bounds = array<i64: 3, 128, 128>}, {pipeline_mode = #tpu.pipeline_mode<synchronous>, transform_indices = @transform_2, window_bounds = array<i64: 3, 1, 128>}, {pipeline_mode = #tpu.pipeline_mode<synchronous>, transform_indices = @transform_3, window_bounds = array<i64: 3, 128, 256>}, {pipeline_mode = #tpu.pipeline_mode<synchronous>, transform_indices = @transform_4, window_bounds = array<i64: 3, 1, 256>}, {transform_indices = @transform_5, window_bounds = array<i64: 8, 128>}, {transform_indices = @transform_6, window_bounds = array<i64: 8, 1>}]} {
    %c0 = arith.constant 0 : index
    %c0_0 = arith.constant 0 : index
    %0 = vector.load %arg1[%c0, %c0_0] : memref<8x128xf32, #tpu.memory_space<vmem>>, vector<8x128xf32>
    %cst = arith.constant 0.000000e+00 : f32
    %1 = vector.broadcast %cst : f32 to vector<8x1xf32>
    %c0_i32 = arith.constant 0 : i32
    %2 = arith.index_cast %c0_i32 : i32 to index
    %c0_1 = arith.constant 0 : index
    %c0_2 = arith.constant 0 : index
    %3 = vector.load %arg2[%2, %c0_1, %c0_2] : memref<3x128x128xf32, #tpu.memory_space<vmem>>, vector<1x128x128xf32>
    %4 = vector.shape_cast %3 : vector<1x128x128xf32> to vector<128x128xf32>
    %cst_3 = arith.constant dense<0.000000e+00> : vector<8x128xf32>
    %5 = tpu.matmul %0, %4, %cst_3 {dimension_numbers = #tpu.dot_dimension_numbers<[1], [0], [0], [1], [0, 0, 1, 1], [], []>} : vector<8x128xf32>, vector<128x128xf32>, vector<8x128xf32> -> vector<8x128xf32>
    %6 = arith.index_cast %c0_i32 : i32 to index
    %c0_4 = arith.constant 0 : index
    %c0_5 = arith.constant 0 : index
    %7 = vector.load %arg3[%6, %c0_4, %c0_5] : memref<3x1x128xf32, #tpu.memory_space<vmem>>, vector<1x1x128xf32>
    %8 = vector.shape_cast %7 : vector<1x1x128xf32> to vector<1x128xf32>
    %9 = vector.broadcast %8 : vector<1x128xf32> to vector<8x128xf32>
    %10 = arith.addf %5, %9 : vector<8x128xf32>
    %cst_6 = arith.constant 0.000000e+00 : f32
    %11 = vector.broadcast %cst_6 : f32 to vector<8x128xf32>
    %12 = arith.maximumf %10, %11 : vector<8x128xf32>
    %13 = arith.index_cast %c0_i32 : i32 to index
    %c0_7 = arith.constant 0 : index
    %c0_8 = arith.constant 0 : index
    %14 = vector.load %arg4[%13, %c0_7, %c0_8] : memref<3x128x256xf32, #tpu.memory_space<vmem>>, vector<1x128x256xf32>
    %15 = vector.shape_cast %14 : vector<1x128x256xf32> to vector<128x256xf32>
    %cst_9 = arith.constant dense<0.000000e+00> : vector<8x256xf32>
    %16 = tpu.matmul %12, %15, %cst_9 {dimension_numbers = #tpu.dot_dimension_numbers<[1], [0], [0], [1], [0, 0, 1, 1], [], []>} : vector<8x128xf32>, vector<128x256xf32>, vector<8x256xf32> -> vector<8x256xf32>
    %17 = arith.index_cast %c0_i32 : i32 to index
    %c0_10 = arith.constant 0 : index
    %c0_11 = arith.constant 0 : index
    %18 = vector.load %arg5[%17, %c0_10, %c0_11] : memref<3x1x256xf32, #tpu.memory_space<vmem>>, vector<1x1x256xf32>
    %19 = vector.shape_cast %18 : vector<1x1x256xf32> to vector<1x256xf32>
    %20 = vector.broadcast %19 : vector<1x256xf32> to vector<8x256xf32>
    %21 = arith.addf %16, %20 : vector<8x256xf32>
    %22 = vector.extract_strided_slice %21 {offsets = [0, 0], sizes = [8, 128], strides = [1, 1]} : vector<8x256xf32> to vector<8x128xf32>
    %23 = vector.extract_strided_slice %21 {offsets = [0, 128], sizes = [8, 128], strides = [1, 1]} : vector<8x256xf32> to vector<8x128xf32>
    %24 = math.exp %23 : vector<8x128xf32>
    %25 = arith.mulf %24, %0 : vector<8x128xf32>
    %26 = arith.addf %25, %22 : vector<8x128xf32>
    %cst_12 = arith.constant dense<0.000000e+00> : vector<8xf32>
    %27 = vector.multi_reduction <add>, %23, %cst_12 [1] : vector<8x128xf32> to vector<8xf32>
    %28 = vector.shape_cast %27 : vector<8xf32> to vector<8x1xf32>
    %29 = arith.addf %1, %28 : vector<8x1xf32>
    %c1_i32 = arith.constant 1 : i32
    %30 = arith.index_cast %c1_i32 : i32 to index
    %c0_13 = arith.constant 0 : index
    %c0_14 = arith.constant 0 : index
    %31 = vector.load %arg2[%30, %c0_13, %c0_14] : memref<3x128x128xf32, #tpu.memory_space<vmem>>, vector<1x128x128xf32>
    %32 = vector.shape_cast %31 : vector<1x128x128xf32> to vector<128x128xf32>
    %cst_15 = arith.constant dense<0.000000e+00> : vector<8x128xf32>
    %33 = tpu.matmul %26, %32, %cst_15 {dimension_numbers = #tpu.dot_dimension_numbers<[1], [0], [0], [1], [0, 0, 1, 1], [], []>} : vector<8x128xf32>, vector<128x128xf32>, vector<8x128xf32> -> vector<8x128xf32>
    %34 = arith.index_cast %c1_i32 : i32 to index
    %c0_16 = arith.constant 0 : index
    %c0_17 = arith.constant 0 : index
    %35 = vector.load %arg3[%34, %c0_16, %c0_17] : memref<3x1x128xf32, #tpu.memory_space<vmem>>, vector<1x1x128xf32>
    %36 = vector.shape_cast %35 : vector<1x1x128xf32> to vector<1x128xf32>
    %37 = vector.broadcast %36 : vector<1x128xf32> to vector<8x128xf32>
    %38 = arith.addf %33, %37 : vector<8x128xf32>
    %cst_18 = arith.constant 0.000000e+00 : f32
    %39 = vector.broadcast %cst_18 : f32 to vector<8x128xf32>
    %40 = arith.maximumf %38, %39 : vector<8x128xf32>
    %41 = arith.index_cast %c1_i32 : i32 to index
    %c0_19 = arith.constant 0 : index
    %c0_20 = arith.constant 0 : index
    %42 = vector.load %arg4[%41, %c0_19, %c0_20] : memref<3x128x256xf32, #tpu.memory_space<vmem>>, vector<1x128x256xf32>
    %43 = vector.shape_cast %42 : vector<1x128x256xf32> to vector<128x256xf32>
    %cst_21 = arith.constant dense<0.000000e+00> : vector<8x256xf32>
    %44 = tpu.matmul %40, %43, %cst_21 {dimension_numbers = #tpu.dot_dimension_numbers<[1], [0], [0], [1], [0, 0, 1, 1], [], []>} : vector<8x128xf32>, vector<128x256xf32>, vector<8x256xf32> -> vector<8x256xf32>
    %45 = arith.index_cast %c1_i32 : i32 to index
    %c0_22 = arith.constant 0 : index
    %c0_23 = arith.constant 0 : index
    %46 = vector.load %arg5[%45, %c0_22, %c0_23] : memref<3x1x256xf32, #tpu.memory_space<vmem>>, vector<1x1x256xf32>
    %47 = vector.shape_cast %46 : vector<1x1x256xf32> to vector<1x256xf32>
    %48 = vector.broadcast %47 : vector<1x256xf32> to vector<8x256xf32>
    %49 = arith.addf %44, %48 : vector<8x256xf32>
    %50 = vector.extract_strided_slice %49 {offsets = [0, 0], sizes = [8, 128], strides = [1, 1]} : vector<8x256xf32> to vector<8x128xf32>
    %51 = vector.extract_strided_slice %49 {offsets = [0, 128], sizes = [8, 128], strides = [1, 1]} : vector<8x256xf32> to vector<8x128xf32>
    %52 = math.exp %51 : vector<8x128xf32>
    %53 = arith.mulf %52, %26 : vector<8x128xf32>
    %54 = arith.addf %53, %50 : vector<8x128xf32>
    %cst_24 = arith.constant dense<0.000000e+00> : vector<8xf32>
    %55 = vector.multi_reduction <add>, %51, %cst_24 [1] : vector<8x128xf32> to vector<8xf32>
    %56 = vector.shape_cast %55 : vector<8xf32> to vector<8x1xf32>
    %57 = arith.addf %29, %56 : vector<8x1xf32>
    %c2_i32 = arith.constant 2 : i32
    %58 = arith.index_cast %c2_i32 : i32 to index
    %c0_25 = arith.constant 0 : index
    %c0_26 = arith.constant 0 : index
    %59 = vector.load %arg2[%58, %c0_25, %c0_26] : memref<3x128x128xf32, #tpu.memory_space<vmem>>, vector<1x128x128xf32>
    %60 = vector.shape_cast %59 : vector<1x128x128xf32> to vector<128x128xf32>
    %cst_27 = arith.constant dense<0.000000e+00> : vector<8x128xf32>
    %61 = tpu.matmul %54, %60, %cst_27 {dimension_numbers = #tpu.dot_dimension_numbers<[1], [0], [0], [1], [0, 0, 1, 1], [], []>} : vector<8x128xf32>, vector<128x128xf32>, vector<8x128xf32> -> vector<8x128xf32>
    %62 = arith.index_cast %c2_i32 : i32 to index
    %c0_28 = arith.constant 0 : index
    %c0_29 = arith.constant 0 : index
    %63 = vector.load %arg3[%62, %c0_28, %c0_29] : memref<3x1x128xf32, #tpu.memory_space<vmem>>, vector<1x1x128xf32>
    %64 = vector.shape_cast %63 : vector<1x1x128xf32> to vector<1x128xf32>
    %65 = vector.broadcast %64 : vector<1x128xf32> to vector<8x128xf32>
    %66 = arith.addf %61, %65 : vector<8x128xf32>
    %cst_30 = arith.constant 0.000000e+00 : f32
    %67 = vector.broadcast %cst_30 : f32 to vector<8x128xf32>
    %68 = arith.maximumf %66, %67 : vector<8x128xf32>
    %69 = arith.index_cast %c2_i32 : i32 to index
    %c0_31 = arith.constant 0 : index
    %c0_32 = arith.constant 0 : index
    %70 = vector.load %arg4[%69, %c0_31, %c0_32] : memref<3x128x256xf32, #tpu.memory_space<vmem>>, vector<1x128x256xf32>
    %71 = vector.shape_cast %70 : vector<1x128x256xf32> to vector<128x256xf32>
    %cst_33 = arith.constant dense<0.000000e+00> : vector<8x256xf32>
    %72 = tpu.matmul %68, %71, %cst_33 {dimension_numbers = #tpu.dot_dimension_numbers<[1], [0], [0], [1], [0, 0, 1, 1], [], []>} : vector<8x128xf32>, vector<128x256xf32>, vector<8x256xf32> -> vector<8x256xf32>
    %73 = arith.index_cast %c2_i32 : i32 to index
    %c0_34 = arith.constant 0 : index
    %c0_35 = arith.constant 0 : index
    %74 = vector.load %arg5[%73, %c0_34, %c0_35] : memref<3x1x256xf32, #tpu.memory_space<vmem>>, vector<1x1x256xf32>
    %75 = vector.shape_cast %74 : vector<1x1x256xf32> to vector<1x256xf32>
    %76 = vector.broadcast %75 : vector<1x256xf32> to vector<8x256xf32>
    %77 = arith.addf %72, %76 : vector<8x256xf32>
    %78 = vector.extract_strided_slice %77 {offsets = [0, 0], sizes = [8, 128], strides = [1, 1]} : vector<8x256xf32> to vector<8x128xf32>
    %79 = vector.extract_strided_slice %77 {offsets = [0, 128], sizes = [8, 128], strides = [1, 1]} : vector<8x256xf32> to vector<8x128xf32>
    %80 = math.exp %79 : vector<8x128xf32>
    %81 = arith.mulf %80, %54 : vector<8x128xf32>
    %82 = arith.addf %81, %78 : vector<8x128xf32>
    %cst_36 = arith.constant dense<0.000000e+00> : vector<8xf32>
    %83 = vector.multi_reduction <add>, %79, %cst_36 [1] : vector<8x128xf32> to vector<8xf32>
    %84 = vector.shape_cast %83 : vector<8xf32> to vector<8x1xf32>
    %85 = arith.addf %57, %84 : vector<8x1xf32>
    %c3_i32 = arith.constant 3 : i32
    %c0_37 = arith.constant 0 : index
    %c0_38 = arith.constant 0 : index
    %86 = vector.load %arg6[%c0_37, %c0_38] : memref<8x128xf32, #tpu.memory_space<vmem>>, vector<8x128xf32>
    tpu.vector_store %arg6[%c0_37, %c0_38], %82 {strides = array<i32>} : memref<8x128xf32, #tpu.memory_space<vmem>>, vector<8x128xf32>,
    %cst_39 = arith.constant 0.000000e+00 : f32
    %87 = vector.broadcast %cst_39 : f32 to vector<8x1xf32>
    %88 = arith.subf %87, %85 : vector<8x1xf32>
    %c0_40 = arith.constant 0 : index
    %c0_41 = arith.constant 0 : index
    %89 = vector.load %arg7[%c0_40, %c0_41] : memref<8x1xf32, #tpu.memory_space<vmem>>, vector<8x1xf32>
    tpu.vector_store %arg7[%c0_40, %c0_41], %88 {strides = array<i32>} : memref<8x1xf32, #tpu.memory_space<vmem>>, vector<8x1xf32>,
    return
  }
  func.func @transform_0(%arg0: i32) -> (i32, i32) {
    %c0_i32 = arith.constant 0 : i32
    %c0_i32_0 = arith.constant 0 : i32
    return %arg0, %c0_i32 : i32, i32
  }
  func.func @transform_1(%arg0: i32) -> (i32, i32, i32) {
    %c0_i32 = arith.constant 0 : i32
    %c0_i32_0 = arith.constant 0 : i32
    %c0_i32_1 = arith.constant 0 : i32
    %c0_i32_2 = arith.constant 0 : i32
    return %c0_i32, %c0_i32_0, %c0_i32_1 : i32, i32, i32
  }
  func.func @transform_2(%arg0: i32) -> (i32, i32, i32) {
    %c0_i32 = arith.constant 0 : i32
    %c0_i32_0 = arith.constant 0 : i32
    %c0_i32_1 = arith.constant 0 : i32
    %c0_i32_2 = arith.constant 0 : i32
    return %c0_i32, %c0_i32_0, %c0_i32_1 : i32, i32, i32
  }
  func.func @transform_3(%arg0: i32) -> (i32, i32, i32) {
    %c0_i32 = arith.constant 0 : i32
    %c0_i32_0 = arith.constant 0 : i32
    %c0_i32_1 = arith.constant 0 : i32
    %c0_i32_2 = arith.constant 0 : i32
    return %c0_i32, %c0_i32_0, %c0_i32_1 : i32, i32, i32
  }
  func.func @transform_4(%arg0: i32) -> (i32, i32, i32) {
    %c0_i32 = arith.constant 0 : i32
    %c0_i32_0 = arith.constant 0 : i32
    %c0_i32_1 = arith.constant 0 : i32
    %c0_i32_2 = arith.constant 0 : i32
    return %c0_i32, %c0_i32_0, %c0_i32_1 : i32, i32, i32
  }
  func.func @transform_5(%arg0: i32) -> (i32, i32) {
    %c0_i32 = arith.constant 0 : i32
    %c0_i32_0 = arith.constant 0 : i32
    return %arg0, %c0_i32 : i32, i32
  }
  func.func @transform_6(%arg0: i32) -> (i32, i32) {
    %c0_i32 = arith.constant 0 : i32
    %c0_i32_0 = arith.constant 0 : i32
    return %arg0, %c0_i32 : i32, i32
  }
}

</mosaic_0001>

<bundles_post_ra>
// kernel: tpu_custom_call.1
= control target key start
LH: loop header
LB: loop body
LE: loop exit
PB: predicated region body
PF: predicated region fallthrough
CT: control target
= control target key end

     0   :  { %12 = vsyncpa [#allocation3], 0  ;;  %s1097_s0 = inlined_call_operand.vmem [shape: f32[8,128], index: 0, kind: input, shape index: {}, may-alias: {0,5}]   ;;  %s1098_s1 = inlined_call_operand.hbm [shape: f32[3,128,128], index: 1, kind: input, shape index: {}]   ;;  %s1099_s2 = inlined_call_operand.vmem [shape: f32[3,1,128], index: 2, kind: input, shape index: {}]   ;;  %s1100_s3 = inlined_call_operand.hbm [shape: f32[3,128,256], index: 3, kind: input, shape index: {}]   ;;  %s1101_s4 = inlined_call_operand.vmem [shape: f32[3,1,256], index: 4, kind: input, shape index: {}]   ;;  %s1102_s5 = inlined_call_operand.vmem [shape: f32[8,128], index: 5, kind: output, shape index: {0}, may-alias: {0,5}]   ;;  %s1103_s6 = inlined_call_operand.vmem [shape: f32[8,1], index: 6, kind: output, shape index: {1}]  }
   0x1   :  { %13 = vsyncpa [#allocation5], 0  ;;  %s942_s21 = smov [#allocation2]  }
   0x2   :  { %s21_s22 = sshll.u32 %s942_s21, 4  ;;  %s22_s22 = int_to_ptr.vmem [resolvable:$true] %s21_s22 }
   0x3   :  { %s906_s23 = scalar_lea.vmem %s22_s22, 6144  ;;  %p911_p1 = scmp.lt.s32.totalorder %s22_s22, %s22_s22 }
   0x4   :  { %p907_p0 = scmp.ne.s32.totalorder %s22_s22, %s906_s23  ;;  %p912_p2 = scmp.lt.s32.totalorder %s906_s23, %s906_s23 }
   0x6   :  { %p913_p3 = por %p912_p2, %p911_p1 }
   0x8   :  { %p914_p4 = pnand %p913_p3, %p907_p0 }
   0xa   :  { %917 = shalt.err (!%p914_p4)
}
   0xb   :  { %s943_s24 = smov 128   ;;  %s944_s25 = smov 8  }
   0xc   :  { %27 = dma.hbm_to_vmem [thread:$0]  %s1098_s1, 6144, %s22_s22, [#allocation3], %s943_s24, %s943_s24, %s944_s25  }
   0xd   :  { %s945_s28 = smov [#allocation4]  }
   0xe   :  { %s35_s29 = sshll.u32 %s945_s28, 4  ;;  %s36_s29 = int_to_ptr.vmem [resolvable:$true] %s35_s29 }
   0xf   :  { %s926_s30 = scalar_lea.vmem %s36_s29, 12288  ;;  %p931_p6 = scmp.lt.s32.totalorder %s36_s29, %s36_s29 }
  0x10   :  { %p927_p5 = scmp.ne.s32.totalorder %s36_s29, %s926_s30  ;;  %p932_p7 = scmp.lt.s32.totalorder %s926_s30, %s926_s30 }
  0x12   :  { %p933_p8 = por %p932_p7, %p931_p6 }
  0x14   :  { %p934_p9 = pnand %p933_p8, %p927_p5 }
  0x16   :  { %937 = shalt.err (!%p934_p9)
}
  0x17   :  { %s946_s7 = smov 256   ;;  %s947_s8 = smov 16  }
  0x18   :  { %41 = dma.hbm_to_vmem [thread:$0]  %s1100_s3, 12288, %s36_s29, [#allocation5], %s946_s7, %s946_s7, %s947_s8  }
  0x19   :  { %938 = dma.done.wait [#allocation3], 6144  }
  0x1a   :  { %939 = vsyncadd [#allocation3], 4294961152 }
  0x1b   :  { %940 = dma.done.wait [#allocation5], 12288  }
  0x1c   :  { %941 = vsyncadd [#allocation5], 4294955008  ;;  %v948_v0 = vmov 0.0   ;;  %vm949_vm0 = vmmov 0   ;;  %v66_v1 = vld [vmem:[#allocation2 + $0x78] sm:$0xff]  ;;  %v65_v2 = vld [vmem:[#allocation2 + $0x70] sm:$0xff] }
  0x1d   :  { %779 = vmatprep.subr.mxu0 %v948_v0  ;;  %811 = vmatprep.mubr.msk.f32.mxu0 %vm949_vm0, %v948_v0  ;;  %v64_v3 = vld [vmem:[#allocation2 + $0x68] sm:$0xff]  ;;  %v63_v4 = vld [vmem:[#allocation2 + $0x60] sm:$0xff]  ;;  %v62_v5 = vld [vmem:[#allocation2 + $0x58] sm:$0xff]  ;;  %vm709_vm1 = vcmask 7168  }
  0x1e   :  { %253 = vmatprep.mubr.f32.mxu1 %v948_v0  ;;  %780 = vmatpush3.msra.mxu0 %v66_v1  ;;  %v176_v6 = vld [vmem:[#allocation4 + $0xf8] sm:$0xff]  ;;  %v175_v7 = vld [vmem:[#allocation4 + $0xf0] sm:$0xff]  ;;  %v174_v8 = vld [vmem:[#allocation4 + $0xe8] sm:$0xff] }
  0x1f   :  { %781 = vmatprep.subr.mxu0 %v948_v0  ;;  %189 = vmatprep.subr.mxu1 %v176_v6  ;;  %v173_v9 = vld [vmem:[#allocation4 + $0xe0] sm:$0xff]  ;;  %v172_v10 = vld [vmem:[#allocation4 + $0xd8] sm:$0xff]  ;;  %v61_v11 = vld [vmem:[#allocation2 + $0x50] sm:$0xff] }
  0x20   :  { %782 = vmatpush3.msra.mxu0 %v65_v2  ;;  %190 = vmatpush1.msra.mxu1 %v175_v7  ;;  %v171_v12 = vld [vmem:[#allocation4 + $0xd0] sm:$0xff]  ;;  %v170_v13 = vld [vmem:[#allocation4 + $0xc8] sm:$0xff]  ;;  %v169_v15 = vld [vmem:[#allocation4 + $0xc0] sm:$0xff] }
  0x21   :  { %783 = vmatprep.subr.mxu0 %v948_v0  ;;  %191 = vmatprep.subr.mxu1 %v174_v8  ;;  %v60_v14 = vld [vmem:[#allocation2 + $0x48] sm:$0xff]  ;;  %v168_v16 = vld [vmem:[#allocation4 + $0xb8] sm:$0xff]  ;;  %v59_v17 = vld [vmem:[#allocation2 + $0x40] sm:$0xff]  ;;  %v179_v8 = vlaneseq }
  0x22   :  { %784 = vmatpush3.msra.mxu0 %v64_v3  ;;  %192 = vmatpush1.msra.mxu1 %v173_v9  ;;  %v167_v18 = vld [vmem:[#allocation4 + $0xb0] sm:$0xff]  ;;  %v166_v19 = vld [vmem:[#allocation4 + $0xa8] sm:$0xff]  ;;  %v58_v20 = vld [vmem:[#allocation2 + $0x38] sm:$0xff] }
  0x23   :  { %785 = vmatprep.subr.mxu0 %v948_v0  ;;  %193 = vmatprep.subr.mxu1 %v172_v10  ;;  %v165_v21 = vld [vmem:[#allocation4 + $0xa0] sm:$0xff]  ;;  %v164_v22 = vld [vmem:[#allocation4 + $0x98] sm:$0xff]  ;;  %v57_v23 = vld [vmem:[#allocation2 + $0x30] sm:$0xff]  ;;  %v180_v9 = vshrl.u32 %v179_v8, 7 }
  0x24   :  { %786 = vmatpush3.msra.mxu0 %v63_v4  ;;  %194 = vmatpush1.msra.mxu1 %v171_v12  ;;  %v163_v24 = vld [vmem:[#allocation4 + $0x90] sm:$0xff]  ;;  %v162_v25 = vld [vmem:[#allocation4 + $0x88] sm:$0xff]  ;;  %v161_v27 = vld [vmem:[#allocation4 + $0x80] sm:$0xff] }
  0x25   :  { %787 = vmatprep.subr.mxu0 %v948_v0  ;;  %195 = vmatprep.subr.mxu1 %v170_v13  ;;  %v56_v26 = vld [vmem:[#allocation2 + $0x28] sm:$0xff]  ;;  %v160_v28 = vld [vmem:[#allocation4 + $0x78] sm:$0xff]  ;;  %v55_v29 = vld [vmem:[#allocation2 + $0x20] sm:$0xff]  ;;  %v1039_v10 = vsub.s32 1, %v180_v9 }
  0x26   :  { %788 = vmatpush3.msra.mxu0 %v62_v5  ;;  %196 = vmatpush1.msra.mxu1 %v169_v15  ;;  %v159_v30 = vld [vmem:[#allocation4 + $0x70] sm:$0xff]  ;;  %v158_v31 = vld [vmem:[#allocation4 + $0x68] sm:$0xff]  ;;  %v54_v32 = vld [vmem:[#allocation2 + $0x18] sm:$0xff] }
  0x27   :  { %789 = vmatprep.subr.mxu0 %v948_v0  ;;  %197 = vmatprep.subr.mxu1 %v168_v16  ;;  %v157_v33 = vld [vmem:[#allocation4 + $0x60] sm:$0xff]  ;;  %v156_v34 = vld [vmem:[#allocation4 + $0x58] sm:$0xff]  ;;  %v53_v35 = vld [vmem:[#allocation2 + $0x10] sm:$0xff] }
  0x28   :  { %790 = vmatpush3.msra.mxu0 %v61_v11  ;;  %198 = vmatpush1.msra.mxu1 %v167_v18  ;;  %v155_v36 = vld [vmem:[#allocation4 + $0x50] sm:$0xff]  ;;  %v154_v37 = vld [vmem:[#allocation4 + $0x48] sm:$0xff]  ;;  %v153_v39 = vld [vmem:[#allocation4 + $0x40] sm:$0xff] }
  0x29   :  { %791 = vmatprep.subr.mxu0 %v948_v0  ;;  %199 = vmatprep.subr.mxu1 %v166_v19  ;;  %v52_v38 = vld [vmem:[#allocation2 + $0x8] sm:$0xff]  ;;  %v152_v40 = vld [vmem:[#allocation4 + $0x38] sm:$0xff]  ;;  %v51_v41 = vld [vmem:[#allocation2] sm:$0xff] }
  0x2a   :  { %792 = vmatpush3.msra.mxu0 %v60_v14  ;;  %200 = vmatpush1.msra.mxu1 %v165_v21  ;;  %v151_v42 = vld [vmem:[#allocation4 + $0x30] sm:$0xff]  ;;  %v1012_v43 = vld [vmem:[%s1097_s0] sm:$0xff]  ;;  %v150_v44 = vld [vmem:[#allocation4 + $0x28] sm:$0xff] }
  0x2b   :  { %793 = vmatprep.subr.mxu0 %v948_v0  ;;  %201 = vmatprep.subr.mxu1 %v164_v22  ;;  %v149_v45 = vld [vmem:[#allocation4 + $0x20] sm:$0xff]  ;;  %v148_v46 = vld [vmem:[#allocation4 + $0x18] sm:$0xff]  ;;  %v147_v47 = vld [vmem:[#allocation4 + $0x10] sm:$0xff] }
  0x2c   :  { %794 = vmatpush3.msra.mxu0 %v59_v17  ;;  %202 = vmatpush1.msra.mxu1 %v163_v24  ;;  %v146_v48 = vld [vmem:[#allocation4 + $0x8] sm:$0xff]  ;;  %v145_v49 = vld [vmem:[#allocation4] sm:$0xff]  ;;  %v283_v50 = vld [vmem:[#allocation2 + $0xf8] sm:$0xff]  ;;  %v1045_v17 = vsub.s32 0, %v180_v9 }
  0x2d   :  { %795 = vmatprep.subr.mxu0 %v948_v0  ;;  %203 = vmatprep.subr.mxu1 %v162_v25  ;;  %v282_v51 = vld [vmem:[#allocation2 + $0xf0] sm:$0xff]  ;;  %v281_v52 = vld [vmem:[#allocation2 + $0xe8] sm:$0xff]  ;;  %v721_v53 = vld [vmem:[%s1099_s2] ss:$0 sm:$0xff] }
  0x2e   :  { %796 = vmatpush3.msra.mxu0 %v58_v20  ;;  %204 = vmatpush1.msra.mxu1 %v161_v27  ;;  %v280_v58 = vld [vmem:[#allocation2 + $0xe0] sm:$0xff]  ;;  %v279_v59 = vld [vmem:[#allocation2 + $0xd8] sm:$0xff]  ;;  %v278_v60 = vld [vmem:[#allocation2 + $0xd0] sm:$0xff] }
  0x2f   :  { %797 = vmatprep.subr.mxu0 %v948_v0  ;;  %205 = vmatprep.subr.mxu1 %v160_v28  ;;  %v277_v61 = vld [vmem:[#allocation2 + $0xc8] sm:$0xff]  ;;  %v276_v62 = vld [vmem:[#allocation2 + $0xc0] sm:$0xff]  ;;  %v275_v63 = vld [vmem:[#allocation2 + $0xb8] sm:$0xff] }
  0x30   :  { %798 = vmatpush3.msra.mxu0 %v57_v23  ;;  %206 = vmatpush1.msra.mxu1 %v159_v30  ;;  %v274_v1 = vld [vmem:[#allocation2 + $0xb0] sm:$0xff]  ;;  %v273_v2 = vld [vmem:[#allocation2 + $0xa8] sm:$0xff]  ;;  %v272_v3 = vld [vmem:[#allocation2 + $0xa0] sm:$0xff] }
  0x31   :  { %799 = vmatprep.subr.mxu0 %v948_v0  ;;  %207 = vmatprep.subr.mxu1 %v158_v31  ;;  %v271_v4 = vld [vmem:[#allocation2 + $0x98] sm:$0xff]  ;;  %v270_v5 = vld [vmem:[#allocation2 + $0x90] sm:$0xff]  ;;  %v269_v6 = vld [vmem:[#allocation2 + $0x88] sm:$0xff] }
  0x32   :  { %800 = vmatpush3.msra.mxu0 %v56_v26  ;;  %208 = vmatpush1.msra.mxu1 %v157_v33  ;;  %v268_v7 = vld [vmem:[#allocation2 + $0x80] sm:$0xff]  ;;  %v395_v18 = vld [vmem:[#allocation4 + $0x1f8] sm:$0xff]  ;;  %v394_v19 = vld [vmem:[#allocation4 + $0x1f0] sm:$0xff] }
  0x33   :  { %801 = vmatprep.subr.mxu0 %v948_v0  ;;  %209 = vmatprep.subr.mxu1 %v156_v34  ;;  %v177_v11 = vld [vmem:[%s1101_s4] sm:$0x3]  ;;  %v393_v20 = vld [vmem:[#allocation4 + $0x1e8] sm:$0xff]  ;;  %v391_v22 = vld [vmem:[#allocation4 + $0x1d8] sm:$0xff] }
  0x34   :  { %802 = vmatpush3.msra.mxu0 %v55_v29  ;;  %210 = vmatpush1.msra.mxu1 %v155_v36  ;;  %v186_v12 = vrot.slane %v177_v11, %v1039_v10  ;;  %v392_v21 = vld [vmem:[#allocation4 + $0x1e0] sm:$0xff]  ;;  %v182_v23 = vrot.slane %v177_v11, %v1045_v17  ;;  %v390_v24 = vld [vmem:[#allocation4 + $0x1d0] sm:$0xff]  ;;  %v389_v25 = vld [vmem:[#allocation4 + $0x1c8] sm:$0xff] }
  0x35   :  { %803 = vmatprep.subr.mxu0 %v948_v0  ;;  %211 = vmatprep.subr.mxu1 %v154_v37  ;;  %v388_v26 = vld [vmem:[#allocation4 + $0x1c0] sm:$0xff]  ;;  %v387_v28 = vld [vmem:[#allocation4 + $0x1b8] sm:$0xff]  ;;  %v386_v31 = vld [vmem:[#allocation4 + $0x1b0] sm:$0xff] }
  0x36   :  { %804 = vmatpush3.msra.mxu0 %v54_v32  ;;  %212 = vmatpush1.msra.mxu1 %v153_v39  ;;  %v385_v32 = vld [vmem:[#allocation4 + $0x1a8] sm:$0xff]  ;;  %v384_v34 = vld [vmem:[#allocation4 + $0x1a0] sm:$0xff]  ;;  %v382_v36 = vld [vmem:[#allocation4 + $0x190] sm:$0xff] }
  0x37   :  { %805 = vmatprep.subr.mxu0 %v948_v0  ;;  %213 = vmatprep.subr.mxu1 %v152_v40  ;;  %v381_v37 = vld [vmem:[#allocation4 + $0x188] sm:$0xff]  ;;  %v379_v39 = vld [vmem:[#allocation4 + $0x178] sm:$0xff]  ;;  %v378_v40 = vld [vmem:[#allocation4 + $0x170] sm:$0xff] }
  0x38   :  { %806 = vmatpush3.msra.mxu0 %v53_v35  ;;  %214 = vmatpush1.msra.mxu1 %v151_v42  ;;  %v383_v35 = vld [vmem:[#allocation4 + $0x198] sm:$0xff]  ;;  %v376_v42 = vld [vmem:[#allocation4 + $0x160] sm:$0xff]  ;;  %v490_v11 = vld [vmem:[#allocation2 + $0x110] sm:$0xff] }
  0x39   :  { %807 = vmatprep.subr.mxu0 %v948_v0  ;;  %215 = vmatprep.subr.mxu1 %v150_v44  ;;  %v374_v44 = vld [vmem:[#allocation4 + $0x150] sm:$0xff]  ;;  %v492_v8 = vld [vmem:[#allocation2 + $0x120] sm:$0xff]  ;;  %v491_v9 = vld [vmem:[#allocation2 + $0x118] sm:$0xff] }
  0x3a   :  { %808 = vmatpush3.msra.mxu0 %v52_v38  ;;  %216 = vmatpush1.msra.mxu1 %v149_v45  ;;  %v380_v38 = vld [vmem:[#allocation4 + $0x180] sm:$0xff]  ;;  %v373_v45 = vld [vmem:[#allocation4 + $0x148] sm:$0xff] }
  0x3b   :  { %809 = vmatprep.subr.mxu0 %v948_v0  ;;  %217 = vmatprep.subr.mxu1 %v148_v46  ;;  %v372_v46 = vld [vmem:[#allocation4 + $0x140] sm:$0xff] }
  0x3c   :  { %810 = vmatpush3.msra.mxu0 %v51_v41  ;;  %218 = vmatpush1.msra.mxu1 %v147_v47  ;;  %v377_v41 = vld [vmem:[#allocation4 + $0x168] sm:$0xff]  ;;  %v371_v47 = vld [vmem:[#allocation4 + $0x138] sm:$0xff] }
  0x3d   :  { %812 = vmatmul.mubr.f32.vlgmr.msra.gmra.mxu0 %v1012_v43  ;;  %814 = vmatprep.subr.mxu0 %v948_v0 }
  0x3e   :  { %846 = vmatprep.mubr.msk.f32.mxu0 %vm949_vm0, %v948_v0  ;;  %219 = vmatprep.subr.mxu1 %v146_v48  ;;  %v370_v48 = vld [vmem:[#allocation4 + $0x130] sm:$0xff] }
  0x3f   :  { %220 = vmatpush1.msra.mxu1 %v145_v49  ;;  %815 = vmatpush3.msra.mxu0 %v283_v50  ;;  %v369_v49 = vld [vmem:[#allocation4 + $0x128] sm:$0xff]  ;;  %v368_v50 = vld [vmem:[#allocation4 + $0x120] sm:$0xff] }
  0x40   :  { %816 = vmatprep.subr.mxu0 %v948_v0  ;;  %409 = vmatprep.subr.mxu1 %v395_v18 }
  0x41   :  { %817 = vmatpush3.msra.mxu0 %v282_v51  ;;  %v367_v51 = vld [vmem:[#allocation4 + $0x118] sm:$0xff] }
  0x42   :  { %818 = vmatprep.subr.mxu0 %v948_v0 }
  0x43   :  { %819 = vmatpush3.msra.mxu0 %v281_v52  ;;  %v366_v52 = vld [vmem:[#allocation4 + $0x110] sm:$0xff] }
  0x44   :  { %820 = vmatprep.subr.mxu0 %v948_v0 }
  0x45   :  { %821 = vmatpush3.msra.mxu0 %v280_v58  ;;  %v723_v58 = vld [vmem:[%s1099_s2 + $0x1] ss:$0 sm:$0xff] }
  0x46   :  { %822 = vmatprep.subr.mxu0 %v948_v0 }
  0x47   :  { %823 = vmatpush3.msra.mxu0 %v279_v59 }
  0x48   :  { %824 = vmatprep.subr.mxu0 %v948_v0 }
  0x49   :  { %825 = vmatpush3.msra.mxu0 %v278_v60 }
  0x4a   :  { %826 = vmatprep.subr.mxu0 %v948_v0 }
  0x4b   :  { %827 = vmatpush3.msra.mxu0 %v277_v61 }
  0x4c   :  { %828 = vmatprep.subr.mxu0 %v948_v0 }
  0x4d   :  { %829 = vmatpush3.msra.mxu0 %v276_v62 }
  0x4e   :  { %830 = vmatprep.subr.mxu0 %v948_v0 }
  0x4f   :  { %831 = vmatpush3.msra.mxu0 %v275_v63  ;;  %v500_v63 = vld [vmem:[#allocation2 + $0x160] sm:$0xff] }
  0x50   :  { %832 = vmatprep.subr.mxu0 %v948_v0 }
  0x51   :  { %833 = vmatpush3.msra.mxu0 %v274_v1  ;;  %v499_v1 = vld [vmem:[#allocation2 + $0x158] sm:$0xff] }
  0x52   :  { %834 = vmatprep.subr.mxu0 %v948_v0 }
  0x53   :  { %835 = vmatpush3.msra.mxu0 %v273_v2  ;;  %v498_v2 = vld [vmem:[#allocation2 + $0x150] sm:$0xff] }
  0x54   :  { %836 = vmatprep.subr.mxu0 %v948_v0 }
  0x55   :  { %837 = vmatpush3.msra.mxu0 %v272_v3  ;;  %v497_v3 = vld [vmem:[#allocation2 + $0x148] sm:$0xff] }
  0x56   :  { %838 = vmatprep.subr.mxu0 %v948_v0 }
  0x57   :  { %839 = vmatpush3.msra.mxu0 %v271_v4  ;;  %v496_v4 = vld [vmem:[#allocation2 + $0x140] sm:$0xff] }
  0x58   :  { %840 = vmatprep.subr.mxu0 %v948_v0 }
  0x59   :  { %841 = vmatpush3.msra.mxu0 %v270_v5  ;;  %v495_v5 = vld [vmem:[#allocation2 + $0x138] sm:$0xff] }
  0x5a   :  { %842 = vmatprep.subr.mxu0 %v948_v0 }
  0x5b   :  { %843 = vmatpush3.msra.mxu0 %v269_v6  ;;  %v494_v6 = vld [vmem:[#allocation2 + $0x130] sm:$0xff] }
  0x5c   :  { %844 = vmatprep.subr.mxu0 %v948_v0 }
  0x5d   :  { %845 = vmatpush3.msra.mxu0 %v268_v7  ;;  %v493_v7 = vld [vmem:[#allocation2 + $0x128] sm:$0xff] }
  0x5e   :  { %849 = vmatprep.subr.mxu0 %v948_v0 }
  0xfd   :  { %v140_v54 = vpop.f32.mrf.mxu0 }
  0xfe   :  { %v141_v55 = vadd.f32 %v721_v53, %v140_v54  ;;  %v365_v53 = vld [vmem:[#allocation4 + $0x108] sm:$0xff]  ;;  %v364_v54 = vld [vmem:[#allocation4 + $0x100] sm:$0xff] }
  0xff   :  { %v813_v56 = vpop.f32.mrf.mxu0 }
 0x100   :  { %v144_v57 = vmax.f32 %v141_v55, 0.0  ;;  %v503_v55 = vld [vmem:[#allocation2 + $0x178] sm:$0xff]  ;;  %v502_v56 = vld [vmem:[#allocation2 + $0x170] sm:$0xff] }
 0x102   :  { %254 = vmatmul.mubr.f32.vlgmr.msra.gmra.mxu1 %v144_v57  ;;  %v501_v57 = vld [vmem:[#allocation2 + $0x168] sm:$0xff] }
 0x103   :  { %473 = vmatprep.mubr.f32.mxu1 %v948_v0  ;;  %410 = vmatpush1.msra.mxu1 %v394_v19 }
 0x104   :  { %411 = vmatprep.subr.mxu1 %v393_v20 }
 0x105   :  { %412 = vmatpush1.msra.mxu1 %v392_v21  ;;  %v615_v21 = vld [vmem:[#allocation4 + $0x2f8] sm:$0xff] }
 0x106   :  { %413 = vmatprep.subr.mxu1 %v391_v22  ;;  %v614_v22 = vld [vmem:[#allocation4 + $0x2f0] sm:$0xff] }
 0x107   :  { %414 = vmatpush1.msra.mxu1 %v390_v24  ;;  %v612_v24 = vld [vmem:[#allocation4 + $0x2e0] sm:$0xff] }
 0x108   :  { %415 = vmatprep.subr.mxu1 %v389_v25  ;;  %v611_v25 = vld [vmem:[#allocation4 + $0x2d8] sm:$0xff] }
 0x109   :  { %416 = vmatpush1.msra.mxu1 %v388_v26  ;;  %v610_v26 = vld [vmem:[#allocation4 + $0x2d0] sm:$0xff] }
 0x10a   :  { %417 = vmatprep.subr.mxu1 %v387_v28 }
 0x10b   :  { %418 = vmatpush1.msra.mxu1 %v386_v31 }
 0x10c   :  { %419 = vmatprep.subr.mxu1 %v385_v32  ;;  %v607_v32 = vld [vmem:[#allocation4 + $0x2b8] sm:$0xff] }
 0x10d   :  { %420 = vmatpush1.msra.mxu1 %v384_v34  ;;  %v606_v34 = vld [vmem:[#allocation4 + $0x2b0] sm:$0xff] }
 0x10e   :  { %421 = vmatprep.subr.mxu1 %v383_v35 }
 0x10f   :  { %422 = vmatpush1.msra.mxu1 %v382_v36  ;;  %v605_v36 = vld [vmem:[#allocation4 + $0x2a8] sm:$0xff] }
 0x110   :  { %423 = vmatprep.subr.mxu1 %v381_v37  ;;  %v604_v37 = vld [vmem:[#allocation4 + $0x2a0] sm:$0xff] }
 0x111   :  { %424 = vmatpush1.msra.mxu1 %v380_v38  ;;  %v603_v38 = vld [vmem:[#allocation4 + $0x298] sm:$0xff] }
 0x112   :  { %425 = vmatprep.subr.mxu1 %v379_v39  ;;  %v602_v39 = vld [vmem:[#allocation4 + $0x290] sm:$0xff] }
 0x113   :  { %426 = vmatpush1.msra.mxu1 %v378_v40  ;;  %v601_v40 = vld [vmem:[#allocation4 + $0x288] sm:$0xff] }
 0x114   :  { %427 = vmatprep.subr.mxu1 %v377_v41  ;;  %v599_v41 = vld [vmem:[#allocation4 + $0x278] sm:$0xff] }
 0x115   :  { %428 = vmatpush1.msra.mxu1 %v376_v42  ;;  %v598_v42 = vld [vmem:[#allocation4 + $0x270] sm:$0xff] }
 0x1c2   :  { %v255_v13 = vpop.f32.mrf.mxu1 }
 0x1c3   :  { %v256_v29 = vadd.f32 %v255_v13, %v182_v23  ;;  %v488_v13 = vld [vmem:[#allocation2 + $0x100] sm:$0xff]  ;;  %v613_v23 = vld [vmem:[#allocation4 + $0x2e8] sm:$0xff] }
 0x1c4   :  { %v257_v14 = vpop.f32.mrf.mxu1 }
 0x1c5   :  { %v258_v15 = vadd.f32 %v257_v14, %v186_v12  ;;  %v489_v12 = vld [vmem:[#allocation2 + $0x108] sm:$0xff]  ;;  %v724_v14 = vld [vmem:[%s1101_s4 + $0x2] sm:$0x3] }
 0x1c7   :  { %v260_v16 = vmul.f32 1.442695, %v258_v15  ;;  %264 = vadd.xlane.f32.xlu0 %v258_v15  ;;  %v406_v15 = vrot.slane %v724_v14, %v1039_v10 }
 0x1c9   :  { %892 = vpow2.f32 %v260_v16 }
 0x1d6   :  { %v893_v27 = vpop.eup %892 }
 0x1d7   :  { %v262_v30 = vmul.f32 %v893_v27, %v1012_v43  ;;  %v375_v43 = vld [vmem:[#allocation4 + $0x158] sm:$0xff]  ;;  %v609_v27 = vld [vmem:[#allocation4 + $0x2c8] sm:$0xff] }
 0x1d8   :  { %429 = vmatprep.subr.mxu1 %v375_v43  ;;  %v597_v43 = vld [vmem:[#allocation4 + $0x268] sm:$0xff] }
 0x1d9   :  { %v1049_v33 = vadd.f32 %v262_v30, %v256_v29  ;;  %430 = vmatpush1.msra.mxu1 %v374_v44  ;;  %v608_v29 = vld [vmem:[#allocation4 + $0x2c0] sm:$0xff] }
 0x1da   :  { %431 = vmatprep.subr.mxu1 %v373_v45  ;;  %v596_v44 = vld [vmem:[#allocation4 + $0x260] sm:$0xff]  ;;  %v595_v45 = vld [vmem:[#allocation4 + $0x258] sm:$0xff] }
 0x1db   :  { %847 = vmatmul.mubr.f32.vlgmr.msra.gmra.mxu0 %v1049_v33  ;;  %432 = vmatpush1.msra.mxu1 %v372_v46  ;;  %v594_v46 = vld [vmem:[#allocation4 + $0x250] sm:$0xff] }
 0x1dc   :  { %881 = vmatprep.mubr.msk.f32.mxu0 %vm949_vm0, %v948_v0  ;;  %433 = vmatprep.subr.mxu1 %v371_v47  ;;  %v593_v47 = vld [vmem:[#allocation4 + $0x248] sm:$0xff] }
 0x1dd   :  { %434 = vmatpush1.msra.mxu1 %v370_v48  ;;  %850 = vmatpush3.msra.mxu0 %v503_v55  ;;  %v592_v48 = vld [vmem:[#allocation4 + $0x240] sm:$0xff]  ;;  %v585_v55 = vld [vmem:[#allocation4 + $0x208] sm:$0xff] }
 0x1de   :  { %435 = vmatprep.subr.mxu1 %v369_v49  ;;  %851 = vmatprep.subr.mxu0 %v948_v0  ;;  %v591_v49 = vld [vmem:[#allocation4 + $0x238] sm:$0xff] }
 0x1df   :  { %436 = vmatpush1.msra.mxu1 %v368_v50  ;;  %852 = vmatpush3.msra.mxu0 %v502_v56  ;;  %v590_v50 = vld [vmem:[#allocation4 + $0x230] sm:$0xff]  ;;  %v584_v56 = vld [vmem:[#allocation4 + $0x200] sm:$0xff] }
 0x1e0   :  { %437 = vmatprep.subr.mxu1 %v367_v51  ;;  %853 = vmatprep.subr.mxu0 %v948_v0  ;;  %v589_v51 = vld [vmem:[#allocation4 + $0x228] sm:$0xff] }
 0x1e1   :  { %438 = vmatpush1.msra.mxu1 %v366_v52  ;;  %854 = vmatpush3.msra.mxu0 %v501_v57  ;;  %v588_v52 = vld [vmem:[#allocation4 + $0x220] sm:$0xff] }
 0x1e2   :  { %439 = vmatprep.subr.mxu1 %v365_v53  ;;  %855 = vmatprep.subr.mxu0 %v948_v0  ;;  %v587_v53 = vld [vmem:[#allocation4 + $0x218] sm:$0xff]  ;;  %v726_v57 = vld [vmem:[%s1099_s2 + $0x2] ss:$0 sm:$0xff] }
 0x1e3   :  { %440 = vmatpush1.msra.mxu1 %v364_v54  ;;  %856 = vmatpush3.msra.mxu0 %v500_v63  ;;  %v586_v54 = vld [vmem:[#allocation4 + $0x210] sm:$0xff] }
 0x1e4   :  { %857 = vmatprep.subr.mxu0 %v948_v0  ;;  %629 = vmatprep.subr.mxu1 %v615_v21 }
 0x1e5   :  { %858 = vmatpush3.msra.mxu0 %v499_v1 }
 0x1e6   :  { %859 = vmatprep.subr.mxu0 %v948_v0 }
 0x1e7   :  { %860 = vmatpush3.msra.mxu0 %v498_v2 }
 0x1e8   :  { %861 = vmatprep.subr.mxu0 %v948_v0 }
 0x1e9   :  { %862 = vmatpush3.msra.mxu0 %v497_v3 }
 0x1ea   :  { %863 = vmatprep.subr.mxu0 %v948_v0 }
 0x1eb   :  { %864 = vmatpush3.msra.mxu0 %v496_v4 }
 0x1ec   :  { %865 = vmatprep.subr.mxu0 %v948_v0 }
 0x1ed   :  { %866 = vmatpush3.msra.mxu0 %v495_v5 }
 0x1ee   :  { %867 = vmatprep.subr.mxu0 %v948_v0 }
 0x1ef   :  { %868 = vmatpush3.msra.mxu0 %v494_v6 }
 0x1f0   :  { %869 = vmatprep.subr.mxu0 %v948_v0 }
 0x1f1   :  { %870 = vmatpush3.msra.mxu0 %v493_v7 }
 0x1f2   :  { %871 = vmatprep.subr.mxu0 %v948_v0 }
 0x1f3   :  { %872 = vmatpush3.msra.mxu0 %v492_v8 }
 0x1f4   :  { %873 = vmatprep.subr.mxu0 %v948_v0 }
 0x1f5   :  { %874 = vmatpush3.msra.mxu0 %v491_v9 }
 0x1f6   :  { %875 = vmatprep.subr.mxu0 %v948_v0 }
 0x1f7   :  { %876 = vmatpush3.msra.mxu0 %v490_v11 }
 0x1f8   :  { %877 = vmatprep.subr.mxu0 %v948_v0 }
 0x1f9   :  { %878 = vmatpush3.msra.mxu0 %v489_v12 }
 0x1fa   :  { %879 = vmatprep.subr.mxu0 %v948_v0 }
 0x1fb   :  { %880 = vmatpush3.msra.mxu0 %v488_v13 }
 0x250   :  { %v265_v11 = vpop.xlane.xlu0 %264 }
 0x29b   :  { %v358_v59 = vpop.f32.mrf.mxu0 }
 0x29c   :  { %v359_v60 = vadd.f32 %v723_v58, %v358_v59 }
 0x29d   :  { %v848_v61 = vpop.f32.mrf.mxu0 }
 0x29e   :  { %v362_v62 = vmax.f32 %v359_v60, 0.0 }
 0x2a0   :  { %474 = vmatmul.mubr.f32.vlgmr.msra.gmra.mxu1 %v362_v62  ;;  %v727_v62 = vld [vmem:[%s1101_s4 + $0x4] sm:$0x3] }
 0x2a1   :  { %693 = vmatprep.mubr.f32.mxu1 %v948_v0  ;;  %v402_v0 = vrot.slane %v724_v14, %v1045_v17  ;;  %630 = vmatpush1.msra.mxu1 %v614_v22  ;;  %v626_v63 = vrot.slane %v727_v62, %v1039_v10  ;;  %v622_v5 = vrot.slane %v727_v62, %v1045_v17 }
 0x2a2   :  { %631 = vmatprep.subr.mxu1 %v613_v23 }
 0x2a3   :  { %632 = vmatpush1.msra.mxu1 %v612_v24 }
 0x2a4   :  { %633 = vmatprep.subr.mxu1 %v611_v25 }
 0x2a5   :  { %634 = vmatpush1.msra.mxu1 %v610_v26 }
 0x2a6   :  { %635 = vmatprep.subr.mxu1 %v609_v27 }
 0x2a7   :  { %636 = vmatpush1.msra.mxu1 %v608_v29 }
 0x2a8   :  { %637 = vmatprep.subr.mxu1 %v607_v32 }
 0x2a9   :  { %638 = vmatpush1.msra.mxu1 %v606_v34 }
 0x2aa   :  { %639 = vmatprep.subr.mxu1 %v605_v36 }
 0x2ab   :  { %640 = vmatpush1.msra.mxu1 %v604_v37 }
 0x2ac   :  { %641 = vmatprep.subr.mxu1 %v603_v38 }
 0x2ad   :  { %642 = vmatpush1.msra.mxu1 %v602_v39 }
 0x2ae   :  { %643 = vmatprep.subr.mxu1 %v601_v40 }
 0x360   :  { %v475_v16 = vpop.f32.mrf.mxu1 }
 0x361   :  { %v476_v30 = vadd.f32 %v475_v16, %v402_v0 }
 0x362   :  { %v477_v18 = vpop.f32.mrf.mxu1 }
 0x363   :  { %v478_v19 = vadd.f32 %v477_v18, %v406_v15 }
 0x365   :  { %v480_v20 = vmul.f32 1.442695, %v478_v19  ;;  %484 = vadd.xlane.f32.xlu0 %v478_v19 }
 0x367   :  { %894 = vpow2.f32 %v480_v20 }
 0x374   :  { %v895_v28 = vpop.eup %894 }
 0x375   :  { %v482_v31 = vmul.f32 %v895_v28, %v1049_v33  ;;  %v600_v33 = vld [vmem:[#allocation4 + $0x280] sm:$0xff] }
 0x376   :  { %644 = vmatpush1.msra.mxu1 %v600_v33 }
 0x377   :  { %v1079_v35 = vadd.f32 %v482_v31, %v476_v30  ;;  %645 = vmatprep.subr.mxu1 %v599_v41 }
 0x378   :  { %646 = vmatpush1.msra.mxu1 %v598_v42 }
 0x379   :  { %882 = vmatmul.mubr.f32.vlgmr.msra.gmra.mxu0 %v1079_v35  ;;  %647 = vmatprep.subr.mxu1 %v597_v43 }
 0x37a   :  { %648 = vmatpush1.msra.mxu1 %v596_v44 }
 0x37b   :  { %649 = vmatprep.subr.mxu1 %v595_v45 }
 0x37c   :  { %650 = vmatpush1.msra.mxu1 %v594_v46 }
 0x37d   :  { %651 = vmatprep.subr.mxu1 %v593_v47 }
 0x37e   :  { %652 = vmatpush1.msra.mxu1 %v592_v48 }
 0x37f   :  { %653 = vmatprep.subr.mxu1 %v591_v49 }
 0x380   :  { %654 = vmatpush1.msra.mxu1 %v590_v50 }
 0x381   :  { %655 = vmatprep.subr.mxu1 %v589_v51 }
 0x382   :  { %656 = vmatpush1.msra.mxu1 %v588_v52 }
 0x383   :  { %657 = vmatprep.subr.mxu1 %v587_v53 }
 0x384   :  { %658 = vmatpush1.msra.mxu1 %v586_v54 }
 0x385   :  { %659 = vmatprep.subr.mxu1 %v585_v55 }
 0x386   :  { %660 = vmatpush1.msra.mxu1 %v584_v56 }
 0x3ee   :  { %v485_v12 = vpop.xlane.xlu0 %484 }
 0x3ef   :  { %v486_v10 = vadd.f32 %v485_v12, %v265_v11 }
 0x439   :  { %v578_v58 = vpop.f32.mrf.mxu0 }
 0x43a   :  { %v579_v59 = vadd.f32 %v726_v57, %v578_v58 }
 0x43b   :  { %v883_v60 = vpop.f32.mrf.mxu0 }
 0x43c   :  { %v582_v61 = vmax.f32 %v579_v59, 0.0 }
 0x43e   :  { %694 = vmatmul.mubr.f32.vlgmr.msra.gmra.mxu1 %v582_v61 }
 0x4fe   :  { %v695_v1 = vpop.f32.mrf.mxu1 }
 0x4ff   :  { %v696_v7 = vadd.f32 %v695_v1, %v622_v5 }
 0x500   :  { %v697_v2 = vpop.f32.mrf.mxu1 }
 0x501   :  { %v698_v3 = vadd.f32 %v697_v2, %v626_v63 }
 0x503   :  { %v700_v4 = vmul.f32 1.442695, %v698_v3  ;;  %704 = vadd.xlane.f32.xlu1 %v698_v3 }
 0x505   :  { %896 = vpow2.f32 %v700_v4 }
 0x512   :  { %v897_v6 = vpop.eup %896 }
 0x513   :  { %v702_v8 = vmul.f32 %v897_v6, %v1079_v35 }
 0x515   :  { %v703_v9 = vadd.f32 %v702_v8, %v696_v7 }
 0x517   :  { %707 = vst [vmem:[%s1102_s5] sm:$0xff] %v703_v9 }
 0x58c   :  { %v705_v13 = vpop.xlane.xlu1 %704 }
 0x58d   :  { %v706_v14 = vadd.f32 %v705_v13, %v486_v10 }
 0x58f   :  { %v708_v15 = vsub.f32 0.0, %v706_v14 }
 0x591   :  { %710 = vst.msk [vmem:[%s1103_s6] sm:$0xff] %vm709_vm1, %v708_v15 }
 0x592   :  { %719 = vsyncpa [#allocation3], 1 }
 0x593   :  { %720 = vsyncpa [#allocation5], 1 }

</bundles_post_ra>
